<compile_context>
chip_gen: v7x
topology: tpu7x:2x2x1
jax: 0.10.0
libtpu: 0.0.40
codegen_flags: <defaults>
</compile_context>

<pallas_src>
import functools
import math

import jax
import jax.numpy as jnp
from jax.experimental import pallas as pl
from jax.experimental.pallas import tpu as pltpu

DIM = 2
LOG_INV_2PI = math.log(1.0 / (2.0 * math.pi))


def _layer1_kernel(scal_ref, xt_ref, yt_ref, lp_ref):
    """Feature-major (lane-dense) layer1 forward for one batch tile.

    scal_ref : SMEM (5,) f32 = [w00, w01, w10, w11, log(1/(2*pi)) + lJ]
    xt_ref   : VMEM (2, TN) f32  -- x^T tile: features on sublanes, batch on lanes
    yt_ref   : VMEM (2, TN) f32  -- y^T tile
    lp_ref   : VMEM (1, TN) f32  -- per-row log-density
    """
    x0 = xt_ref[0:1, :]                     # (1, TN)
    x1 = xt_ref[1:2, :]                     # (1, TN)

    w00 = scal_ref[0]
    w01 = scal_ref[1]
    w10 = scal_ref[2]
    w11 = scal_ref[3]
    const = scal_ref[4]                     # log(1/(2*pi)) + lJ, folded in wrapper

    # y = x @ W as VPU broadcast-FMAs (a K=2/N=2 dot would waste the MXU).
    y0 = w00 * x0 + w10 * x1
    y1 = w01 * x0 + w11 * x1
    yt_ref[0:1, :] = y0
    yt_ref[1:2, :] = y1

    # log p = const - 0.5*(y0^2 + y1^2): pure elementwise, no cross-lane reduce.
    lp_ref[...] = const - 0.5 * (y0 * y0 + y1 * y1)


def _round_up(a, b):
    return ((a + b - 1) // b) * b


@functools.partial(jax.jit, static_argnames=("block_n",))
def layer1_forward(x, A, *, block_n=32768):
    """x: (N, 2) float32. A: (2, 2) raw LU parameter.

    Returns (y (N, 2), logp (N,)) matching layer1.forward semantics.
    """
    N, D = x.shape
    assert D == DIM

    # Plain-JAX glue: compose W = (tril(A,-1)+I) @ triu(A) and the scalar logdet.
    L = jnp.tril(A, -1) + jnp.eye(D, dtype=A.dtype)
    U = jnp.triu(A)
    W = (L @ U).astype(jnp.float32)
    lj = jnp.sum(jnp.log(jnp.abs(jnp.diag(U)))).astype(jnp.float32)
    scal = jnp.stack(
        [W[0, 0], W[0, 1], W[1, 0], W[1, 1], LOG_INV_2PI + lj]
    ).astype(jnp.float32)

    # Lane-dense tiling of the batch axis.
    tn = min(_round_up(block_n, 128), _round_up(N, 128))
    n_pad = _round_up(N, tn)

    xt = x.astype(jnp.float32).T            # (2, N) feature-major (layout plumbing)
    if n_pad != N:
        xt = jnp.pad(xt, ((0, 0), (0, n_pad - N)))

    yt, lp = pl.pallas_call(
        _layer1_kernel,
        out_shape=(
            jax.ShapeDtypeStruct((DIM, n_pad), jnp.float32),
            jax.ShapeDtypeStruct((1, n_pad), jnp.float32),
        ),
        grid_spec=pltpu.PrefetchScalarGridSpec(
            num_scalar_prefetch=1,          # scal -> SMEM, visible to index_maps
            grid=(n_pad // tn,),
            in_specs=[pl.BlockSpec((DIM, tn), lambda i, s: (0, i))],
            out_specs=(
                pl.BlockSpec((DIM, tn), lambda i, s: (0, i)),
                pl.BlockSpec((1, tn), lambda i, s: (0, i)),
            ),
        ),
        compiler_params=pltpu.CompilerParams(
            dimension_semantics=("parallel",),       # megacore / 2-TC sharding
            vmem_limit_bytes=32 * 1024 * 1024,       # safe on v5e/v6e/v7x
        ),
    )(scal, xt)

    y = yt[:, :N].T
    logp = lp[0, :N]
    return y, logp


def _reference(x, A):
    D = x.shape[1]
    L = jnp.tril(A, -1) + jnp.eye(D, dtype=A.dtype)
    U = jnp.triu(A)
    W = L @ U
    lj = jnp.sum(jnp.log(jnp.abs(jnp.diag(U))))
    y = x @ W
    logp = LOG_INV_2PI - jnp.sum(y * y, axis=1) / 2.0 + lj
    return y, logp


if __name__ == "__main__":
    key = jax.random.PRNGKey(0)
    kx, ka = jax.random.split(key)

    # Small batch, deliberately NOT a multiple of 128 to exercise the padding
    # path; small block_n forces a multi-step (3-tile) grid.
    N = 300
    x = jax.random.normal(kx, (N, DIM), dtype=jnp.float32)
    # Deterministic LU parameter; add identity so diag(U) is safely nonzero.
    A = (0.5 * jax.random.normal(ka, (DIM, DIM), dtype=jnp.float32)
         + jnp.eye(DIM, dtype=jnp.float32))

    y, logp = layer1_forward(x, A, block_n=128)
    jax.block_until_ready((y, logp))

    y_ref, logp_ref = _reference(x, A)
    assert y.shape == (N, DIM) and logp.shape == (N,)
    assert jnp.allclose(y, y_ref, atol=1e-5, rtol=1e-5), "y mismatch"
    assert jnp.allclose(logp, logp_ref, atol=1e-5, rtol=1e-5), "logp mismatch"

    print("KERNEL_OK")
</pallas_src>

<mosaic_0001>
module attributes {stable_mosaic.version = 11 : i64} {
  func.func @_layer1_kernel(%arg0: i32, %arg1: memref<5xf32, #tpu.memory_space<smem>>, %arg2: memref<2x128xf32, #tpu.memory_space<vmem>>, %arg3: memref<2x128xf32, #tpu.memory_space<vmem>>, %arg4: memref<1x128xf32, #tpu.memory_space<vmem>>) attributes {dimension_semantics = [#tpu.dimension_semantics<parallel>], iteration_bounds = array<i64: 3>, scalar_prefetch = 1 : i64, scratch_operands = 0 : i64, tpu.core_type = #tpu.core_type<tc>, window_params = [{transform_indices = @transform_0, window_bounds = array<i64: 2, 128>}, {transform_indices = @transform_1, window_bounds = array<i64: 2, 128>}, {transform_indices = @transform_2, window_bounds = array<i64: 1, 128>}]} {
    %c0 = arith.constant 0 : index
    %c0_0 = arith.constant 0 : index
    %0 = vector.load %arg2[%c0, %c0_0] : memref<2x128xf32, #tpu.memory_space<vmem>>, vector<1x128xf32>
    %c1 = arith.constant 1 : index
    %c0_1 = arith.constant 0 : index
    %1 = vector.load %arg2[%c1, %c0_1] : memref<2x128xf32, #tpu.memory_space<vmem>>, vector<1x128xf32>
    %c0_2 = arith.constant 0 : index
    %2 = memref.load %arg1[%c0_2] : memref<5xf32, #tpu.memory_space<smem>>
    %c1_3 = arith.constant 1 : index
    %3 = memref.load %arg1[%c1_3] : memref<5xf32, #tpu.memory_space<smem>>
    %c2 = arith.constant 2 : index
    %4 = memref.load %arg1[%c2] : memref<5xf32, #tpu.memory_space<smem>>
    %c3 = arith.constant 3 : index
    %5 = memref.load %arg1[%c3] : memref<5xf32, #tpu.memory_space<smem>>
    %c4 = arith.constant 4 : index
    %6 = memref.load %arg1[%c4] : memref<5xf32, #tpu.memory_space<smem>>
    %7 = vector.broadcast %2 : f32 to vector<1x128xf32>
    %8 = arith.mulf %7, %0 : vector<1x128xf32>
    %9 = vector.broadcast %4 : f32 to vector<1x128xf32>
    %10 = arith.mulf %9, %1 : vector<1x128xf32>
    %11 = arith.addf %8, %10 : vector<1x128xf32>
    %12 = vector.broadcast %3 : f32 to vector<1x128xf32>
    %13 = arith.mulf %12, %0 : vector<1x128xf32>
    %14 = vector.broadcast %5 : f32 to vector<1x128xf32>
    %15 = arith.mulf %14, %1 : vector<1x128xf32>
    %16 = arith.addf %13, %15 : vector<1x128xf32>
    %c0_4 = arith.constant 0 : index
    %c0_5 = arith.constant 0 : index
    %17 = vector.load %arg3[%c0_4, %c0_5] : memref<2x128xf32, #tpu.memory_space<vmem>>, vector<1x128xf32>
    tpu.vector_store %arg3[%c0_4, %c0_5], %11 {strides = array<i32>} : memref<2x128xf32, #tpu.memory_space<vmem>>, vector<1x128xf32>,
    %c1_6 = arith.constant 1 : index
    %c0_7 = arith.constant 0 : index
    %18 = vector.load %arg3[%c1_6, %c0_7] : memref<2x128xf32, #tpu.memory_space<vmem>>, vector<1x128xf32>
    tpu.vector_store %arg3[%c1_6, %c0_7], %16 {strides = array<i32>} : memref<2x128xf32, #tpu.memory_space<vmem>>, vector<1x128xf32>,
    %19 = arith.mulf %11, %11 : vector<1x128xf32>
    %20 = arith.mulf %16, %16 : vector<1x128xf32>
    %21 = arith.addf %19, %20 : vector<1x128xf32>
    %cst = arith.constant 5.000000e-01 : f32
    %22 = vector.broadcast %cst : f32 to vector<1x128xf32>
    %23 = arith.mulf %22, %21 : vector<1x128xf32>
    %24 = vector.broadcast %6 : f32 to vector<1x128xf32>
    %25 = arith.subf %24, %23 : vector<1x128xf32>
    %c0_8 = arith.constant 0 : index
    %c0_9 = arith.constant 0 : index
    %26 = vector.load %arg4[%c0_8, %c0_9] : memref<1x128xf32, #tpu.memory_space<vmem>>, vector<1x128xf32>
    tpu.vector_store %arg4[%c0_8, %c0_9], %25 {strides = array<i32>} : memref<1x128xf32, #tpu.memory_space<vmem>>, vector<1x128xf32>,
    return
  }
  func.func @transform_0(%arg0: i32, %arg1: memref<5xf32, #tpu.memory_space<smem>>) -> (i32, i32) {
    %c0_i32 = arith.constant 0 : i32
    %c0_i32_0 = arith.constant 0 : i32
    return %c0_i32, %arg0 : i32, i32
  }
  func.func @transform_1(%arg0: i32, %arg1: memref<5xf32, #tpu.memory_space<smem>>) -> (i32, i32) {
    %c0_i32 = arith.constant 0 : i32
    %c0_i32_0 = arith.constant 0 : i32
    return %c0_i32, %arg0 : i32, i32
  }
  func.func @transform_2(%arg0: i32, %arg1: memref<5xf32, #tpu.memory_space<smem>>) -> (i32, i32) {
    %c0_i32 = arith.constant 0 : i32
    %c0_i32_0 = arith.constant 0 : i32
    return %c0_i32, %arg0 : i32, i32
  }
}

</mosaic_0001>

<bundles_post_ra>
// kernel: layer1_forward.1
= control target key start
LH: loop header
LB: loop body
LE: loop exit
PB: predicated region body
PF: predicated region fallthrough
CT: control target
= control target key end

     0   :  { %s347_s0 = inlined_call_operand.vmem [shape: f32[5], index: 0, kind: input, shape index: {}]   ;;  %s348_s1 = inlined_call_operand.vmem [shape: f32[2,384], index: 1, kind: input, shape index: {}]   ;;  %s349_s2 = inlined_call_operand.vmem [shape: f32[2,384], index: 2, kind: output, shape index: {0}]   ;;  %s350_s3 = inlined_call_operand.vmem [shape: f32[1,384], index: 3, kind: output, shape index: {1}]  }
   0x1   :  { %s9_s14 = sshll.u32 %s347_s0, 4  ;;  %s10_s14 = int_to_ptr.vmem [resolvable:$true] %s9_s14 }
   0x2   :  { %s281_s15 = scalar_lea.vmem %s10_s14, 16  ;;  %p286_p1 = scmp.lt.s32.totalorder %s10_s14, %s10_s14 }
   0x3   :  { %p282_p0 = scmp.ne.s32.totalorder %s10_s14, %s281_s15  ;;  %p287_p2 = scmp.lt.s32.totalorder %s281_s15, %s281_s15 }
   0x5   :  { %p288_p3 = por %p287_p2, %p286_p1 }
   0x7   :  { %p289_p4 = pnand %p288_p3, %p282_p0 }
   0x9   :  { %292 = shalt.err (!%p289_p4)  }
   0xa   :  { %s303_s16 = smov [#allocation3]  }
   0xb   :  { %12 = dma.vmem_to_smem %s10_s14, 16, %s303_s16, [#allocation2] }
   0xc   :  { %297 = dma.done.wait [#allocation2], 16 }
   0xd   :  { %298 = vsyncadd [#allocation2], 4294967280 }
   0xe   :  { %14 = sfence }
   0xf   :  { %s327_s17 = smov 0  }
  0x10 LB: > { %s259_s0 = sadd.s32 4294967295, %s301_s17   ;;  %p263_p5 = scmp.ge.s32.totalorder %s301_s17, 1  ;;  %s301_s17 = sphi %s327_s17, %s20_s17  }
  0x11   : > { %p121_p6 = scmp.lt.s32.totalorder %s301_s17, 4 }
  0x13   : > { %p122_p7 = pnand %p263_p5, %p121_p6 }
  0x14   : > { %p144_p8 = scmp.lt.s32.totalorder (!%p122_p7), %s259_s0, 2  ;;  %s157_s18 = sld [smem:[#allocation3]] (!%p122_p7) }
  0x15   : > { %125 = sbr.rel (%p122_p7) target bundleno = 45 (0x2d), region = 24  ;;  %s267_s19 = sld [smem:[#allocation3 + $0x2]] (!%p122_p7) }
  0x16   : > { %s266_s20 = sld [smem:[#allocation3 + $0x1]] (!%p122_p7)  ;;  %s268_s21 = sld [smem:[#allocation3 + $0x3]] (!%p122_p7) }
  0x17   : > { %s269_s29 = sld [smem:[#allocation3 + $0x4]] (!%p122_p7) }
  0x1a   : > { %v162_v2 = vstv (!%p122_p7), %s157_s18 }
  0x1b   : > { %v164_v4 = vstv (!%p122_p7), %s267_s19 }
  0x1c   : > { %s352_s0 = smov (!%p144_p8, %s259_s0), 2  ;;  %v167_v5 = vstv %s266_s20  ;;  %v169_v8 = vstv %s268_s21 }
  0x1d   : > { %s264_s22 = sshll.u32 %s352_s0, 1  ;;  %v178_v15 = vstv %s269_s29  ;;  %s154_s5 = scalar_lea.vmem %s350_s3, %s352_s0 }
  0x1e   : > { %s147_s25 = scalar_lea.vmem %s348_s1, %s264_s22  ;;  %s151_s28 = scalar_lea.vmem %s349_s2, %s264_s22 }
  0x1f   : > { %v155_v0 = vld [vmem:[%s147_s25] sm:$0x1]  ;;  %v156_v1 = vld [vmem:[%s147_s25 + $0x1] sm:$0x1] }
  0x20   : > { %v163_v3 = vmul.f32 %v162_v2, %v155_v0  ;;  %v165_v6 = vmul.f32 %v164_v4, %v156_v1  ;;  %v168_v7 = vmul.f32 %v167_v5, %v155_v0  ;;  %v170_v10 = vmul.f32 %v169_v8, %v156_v1 }
  0x22   : > { %v166_v9 = vadd.f32 %v165_v6, %v163_v3  ;;  %v171_v12 = vadd.f32 %v170_v10, %v168_v7 }
  0x24   : > { %172 = vst [vmem:[%s151_s28] sm:$0x1] %v166_v9  ;;  %v174_v11 = vmul.f32 %v166_v9, %v166_v9  ;;  %173 = vst [vmem:[%s151_s28 + $0x1] sm:$0x1] %v171_v12  ;;  %v175_v13 = vmul.f32 %v171_v12, %v171_v12 }
  0x26   : > { %v176_v14 = vadd.f32 %v175_v13, %v174_v11 }
  0x28   : > { %v177_v16 = vmul.f32 0.5, %v176_v14 }
  0x2a   : > { %v179_v17 = vsub.f32 %v178_v15, %v177_v16 }
  0x2c   : > { %180 = vst [vmem:[%s154_s5] sm:$0x1] %v179_v17 }
  0x2d PF: > { %s20_s17 = sadd.s32 1, %s301_s17  }
  0x2e   : > { %p17_p9 = scmp.ge.s32.totalorder %s20_s17, 5  }
  0x30   :  { %19 = sbr.rel (!%p17_p9) target bundleno = 16 (0x10), region = 66 }

</bundles_post_ra>
